<compile_context>
chip_gen: v7x
topology: tpu7x:2x2x1
jax: 0.10.0
libtpu: 0.0.40
codegen_flags: <defaults>
</compile_context>

<pallas_src>
import functools

import jax
import jax.numpy as jnp
from jax.experimental import pallas as pl
from jax.experimental.pallas import tpu as pltpu


# --------------------------------------------------------------------------
# Transposed 1-D convolution + bias + ReLU
# --------------------------------------------------------------------------
def _deconv_bias_relu_kernel(x_ref, w_ref, s_ref, b_ref, o_ref, *, num_taps):
    # x_ref: (1, T, Cin)   w_ref: (K, Cin, Cout)   s_ref: (K, H, T)
    # b_ref: (1, Cout)     o_ref: (1, H, Cout)
    x = x_ref[0].astype(jnp.float32)                       # (T, Cin)
    h_out, c_out = o_ref.shape[1], o_ref.shape[2]
    acc = jnp.zeros((h_out, c_out), jnp.float32)
    for k in range(num_taps):                              # K is small (3-5), static unroll
        # Per-tap contribution on the MXU: (T, Cout)
        p = jnp.dot(x, w_ref[k].astype(jnp.float32),
                    preferred_element_type=jnp.float32)
        # Scatter rows to h = t*stride + k via a one-hot matrix (also MXU).
        acc = acc + jnp.dot(s_ref[k], p, preferred_element_type=jnp.float32)
    y = acc + b_ref[...]                                   # bias broadcast over rows
    o_ref[0] = jnp.maximum(y, 0.0).astype(o_ref.dtype)     # fused ReLU


def deconv1d_bias_relu(x, w_taps, bias, stride):
    """ConvTranspose along the sequence axis, fused with bias + ReLU.

    x:      (B, T, Cin)   sequence on sublanes, channels on lanes
    w_taps: (K, Cin, Cout)   (torch ConvTranspose2d weight re-laid-out)
    bias:   (Cout,)
    returns (B, H, Cout) with H = (T - 1) * stride + K
    """
    B, T, Cin = x.shape
    K, _, Cout = w_taps.shape
    H = (T - 1) * stride + K

    # One-hot scatter matrices: S[k, h, t] = 1  iff  h == t*stride + k.
    hh = jnp.arange(H)[:, None]
    tt = jnp.arange(T)[None, :]
    scat = jnp.stack(
        [(hh == tt * stride + k).astype(jnp.float32) for k in range(K)], axis=0)

    bias2d = bias.reshape(1, Cout).astype(jnp.float32)

    kernel = functools.partial(_deconv_bias_relu_kernel, num_taps=K)
    return pl.pallas_call(
        kernel,
        out_shape=jax.ShapeDtypeStruct((B, H, Cout), x.dtype),
        grid_spec=pltpu.PrefetchScalarGridSpec(
            num_scalar_prefetch=0,
            grid=(B,),
            in_specs=[
                pl.BlockSpec((1, T, Cin), lambda b: (b, 0, 0)),
                pl.BlockSpec((K, Cin, Cout), lambda b: (0, 0, 0)),
                pl.BlockSpec((K, H, T), lambda b: (0, 0, 0)),
                pl.BlockSpec((1, Cout), lambda b: (0, 0)),
            ],
            out_specs=pl.BlockSpec((1, H, Cout), lambda b: (b, 0, 0)),
        ),
        compiler_params=pltpu.CompilerParams(
            dimension_semantics=("parallel",)),
    )(x, w_taps, scat, bias2d)


# --------------------------------------------------------------------------
# L2-normalize + projection onto embedding^T / temperature + log_softmax
# --------------------------------------------------------------------------
def _norm_proj_logsoftmax_kernel(x_ref, wt_ref, o_ref, *, temperature):
    # x_ref: (1, S, E)   wt_ref: (E, V)   o_ref: (1, S, V)
    x = x_ref[0].astype(jnp.float32)                        # (S, E)
    nrm = jnp.sqrt(jnp.sum(x * x, axis=-1, keepdims=True))  # torch.norm(p=2, dim=2)
    xn = x / nrm
    logits = jnp.dot(xn, wt_ref[...].astype(jnp.float32),
                     preferred_element_type=jnp.float32) / temperature
    m = jnp.max(logits, axis=-1, keepdims=True)
    lse = jnp.log(jnp.sum(jnp.exp(logits - m), axis=-1, keepdims=True)) + m
    o_ref[0] = (logits - lse).astype(o_ref.dtype)           # log_softmax, lane-dense store


def normalize_project_logsoftmax(x, emb_weight, temperature):
    """x: (B, S, E), emb_weight: (V, E).  Returns log_softmax((x/||x||) @ W^T / T)."""
    B, S, E = x.shape
    V = emb_weight.shape[0]
    wt = jnp.transpose(emb_weight, (1, 0))                  # (E, V): vocab on lanes

    kernel = functools.partial(_norm_proj_logsoftmax_kernel,
                               temperature=float(temperature))
    return pl.pallas_call(
        kernel,
        out_shape=jax.ShapeDtypeStruct((B, S, V), x.dtype),
        grid_spec=pltpu.PrefetchScalarGridSpec(
            num_scalar_prefetch=0,
            grid=(B,),
            in_specs=[
                pl.BlockSpec((1, S, E), lambda b: (b, 0, 0)),
                pl.BlockSpec((E, V), lambda b: (0, 0)),
            ],
            out_specs=pl.BlockSpec((1, S, V), lambda b: (b, 0, 0)),
        ),
        compiler_params=pltpu.CompilerParams(
            dimension_semantics=("parallel",)),
    )(x, wt)


# --------------------------------------------------------------------------
# Full DeconvolutionDecoder.forward (use_batch_norm=False branch)
# --------------------------------------------------------------------------
def deconvolution_decoder_forward(h, params, temperature):
    # h: (B, C0, T0, 1)  — PyTorch NCHW with the embed dim already collapsed.
    x = jnp.transpose(jnp.squeeze(h, axis=-1), (0, 2, 1))         # (B, T0, C0)
    x = deconv1d_bias_relu(x, params["w1"], params["b1"], params["s1"])   # relu(deconv1)
    x = deconv1d_bias_relu(x, params["w2"], params["b2"], params["s2"])   # relu(deconv2)
    x = deconv1d_bias_relu(x, params["w3"], params["b3"], params["s3"])   # relu(deconv3).squeeze()
    return normalize_project_logsoftmax(x, params["emb"], temperature)


# --------------------------------------------------------------------------
# Pure-JAX reference (different code path) for a sanity check
# --------------------------------------------------------------------------
def _ref_deconv(x, w_taps, bias, stride):
    B, T, Cin = x.shape
    K, _, Cout = w_taps.shape
    H = (T - 1) * stride + K
    y = jnp.zeros((B, H, Cout), jnp.float32)
    for k in range(K):
        contrib = jnp.einsum("btc,cd->btd", x, w_taps[k])
        y = y.at[:, k:k + (T - 1) * stride + 1:stride, :].add(contrib)
    return jax.nn.relu(y + bias[None, None, :])


def _ref_forward(h, params, temperature):
    x = jnp.transpose(jnp.squeeze(h, axis=-1), (0, 2, 1))
    x = _ref_deconv(x, params["w1"], params["b1"], params["s1"])
    x = _ref_deconv(x, params["w2"], params["b2"], params["s2"])
    x = _ref_deconv(x, params["w3"], params["b3"], params["s3"])
    nrm = jnp.sqrt(jnp.sum(x * x, axis=-1, keepdims=True))
    xn = x / nrm
    logits = jnp.einsum("bse,ev->bsv", xn,
                        jnp.transpose(params["emb"], (1, 0))) / temperature
    return jax.nn.log_softmax(logits, axis=-1)


if __name__ == "__main__":
    key = jax.random.PRNGKey(0)
    ks = jax.random.split(key, 8)

    # Small config (decoder-order filter_counts / filter_sizes / strides).
    B = 2
    embed_dim = 32
    vocab = 256
    filter_counts = [64, 48, 32]     # deconv1: 64->48, deconv2: 48->32, deconv3: 32->1
    filter_sizes = [3, 3, 4]
    strides = [2, 2, 1]
    temperature = 0.5
    T0 = 8                           # encoded sequence length (h height)

    # PyTorch-layout ConvTranspose2d weights, then converted to (K, Cin, Cout).
    w1_t = 0.1 * jax.random.normal(
        ks[0], (filter_counts[0], filter_counts[1], filter_sizes[0], 1), jnp.float32)
    b1 = 0.1 * jax.random.normal(ks[1], (filter_counts[1],), jnp.float32)
    w2_t = 0.1 * jax.random.normal(
        ks[2], (filter_counts[1], filter_counts[2], filter_sizes[1], 1), jnp.float32)
    b2 = 0.1 * jax.random.normal(ks[3], (filter_counts[2],), jnp.float32)
    w3_t = 0.1 * jax.random.normal(
        ks[4], (filter_counts[2], 1, filter_sizes[2], embed_dim), jnp.float32)
    b3 = 0.1 * jax.random.normal(ks[5], (1,), jnp.float32)
    emb = jax.random.normal(ks[6], (vocab, embed_dim), jnp.float32)

    params = {
        "w1": jnp.transpose(w1_t[:, :, :, 0], (2, 0, 1)),   # (K1, C0, C1)
        "b1": b1,
        "s1": strides[0],
        "w2": jnp.transpose(w2_t[:, :, :, 0], (2, 0, 1)),   # (K2, C1, C2)
        "b2": b2,
        "s2": strides[1],
        "w3": jnp.transpose(w3_t[:, 0, :, :], (1, 0, 2)),   # (K3, C2, E)
        "b3": jnp.full((embed_dim,), b3[0], jnp.float32),   # scalar bias of deconv3
        "s3": strides[2],
        "emb": emb,
    }

    h = jax.random.normal(ks[7], (B, filter_counts[0], T0, 1), jnp.float32)

    out = deconvolution_decoder_forward(h, params, temperature)
    out = jax.block_until_ready(out)

    ref = _ref_forward(h, params, temperature)
    assert out.shape == ref.shape, (out.shape, ref.shape)
    max_err = float(jnp.max(jnp.abs(out - ref)))
    assert jnp.allclose(out, ref, atol=2e-3, rtol=2e-3), f"max_err={max_err}"

    print("KERNEL_OK")
</pallas_src>

<mosaic_0001>
module attributes {stable_mosaic.version = 11 : i64} {
  func.func @_deconv_bias_relu_kernel(%arg0: i32, %arg1: memref<1x8x64xf32, #tpu.memory_space<vmem>>, %arg2: memref<3x64x48xf32, #tpu.memory_space<vmem>>, %arg3: memref<3x17x8xf32, #tpu.memory_space<vmem>>, %arg4: memref<1x48xf32, #tpu.memory_space<vmem>>, %arg5: memref<1x17x48xf32, #tpu.memory_space<vmem>>) attributes {dimension_semantics = [#tpu.dimension_semantics<parallel>], iteration_bounds = array<i64: 2>, scalar_prefetch = 0 : i64, scratch_operands = 0 : i64, tpu.core_type = #tpu.core_type<tc>, window_params = [{transform_indices = @transform_0, window_bounds = array<i64: 1, 8, 64>}, {pipeline_mode = #tpu.pipeline_mode<synchronous>, transform_indices = @transform_1, window_bounds = array<i64: 3, 64, 48>}, {pipeline_mode = #tpu.pipeline_mode<synchronous>, transform_indices = @transform_2, window_bounds = array<i64: 3, 17, 8>}, {pipeline_mode = #tpu.pipeline_mode<synchronous>, transform_indices = @transform_3, window_bounds = array<i64: 1, 48>}, {transform_indices = @transform_4, window_bounds = array<i64: 1, 17, 48>}]} {
    %c0 = arith.constant 0 : index
    %c0_0 = arith.constant 0 : index
    %c0_1 = arith.constant 0 : index
    %0 = vector.load %arg1[%c0, %c0_0, %c0_1] : memref<1x8x64xf32, #tpu.memory_space<vmem>>, vector<1x8x64xf32>
    %1 = vector.shape_cast %0 : vector<1x8x64xf32> to vector<8x64xf32>
    %cst = arith.constant 0.000000e+00 : f32
    %2 = vector.broadcast %cst : f32 to vector<17x48xf32>
    %c0_2 = arith.constant 0 : index
    %c0_3 = arith.constant 0 : index
    %c0_4 = arith.constant 0 : index
    %3 = vector.load %arg2[%c0_2, %c0_3, %c0_4] : memref<3x64x48xf32, #tpu.memory_space<vmem>>, vector<1x64x48xf32>
    %4 = vector.shape_cast %3 : vector<1x64x48xf32> to vector<64x48xf32>
    %cst_5 = arith.constant dense<0.000000e+00> : vector<8x48xf32>
    %5 = tpu.matmul %1, %4, %cst_5 {dimension_numbers = #tpu.dot_dimension_numbers<[1], [0], [0], [1], [0, 0, 1, 1], [], []>} : vector<8x64xf32>, vector<64x48xf32>, vector<8x48xf32> -> vector<8x48xf32>
    %c0_6 = arith.constant 0 : index
    %c0_7 = arith.constant 0 : index
    %c0_8 = arith.constant 0 : index
    %6 = vector.load %arg3[%c0_6, %c0_7, %c0_8] : memref<3x17x8xf32, #tpu.memory_space<vmem>>, vector<1x17x8xf32>
    %7 = vector.shape_cast %6 : vector<1x17x8xf32> to vector<17x8xf32>
    %cst_9 = arith.constant dense<0.000000e+00> : vector<17x48xf32>
    %8 = tpu.matmul %7, %5, %cst_9 {dimension_numbers = #tpu.dot_dimension_numbers<[1], [0], [0], [1], [0, 0, 1, 1], [], []>} : vector<17x8xf32>, vector<8x48xf32>, vector<17x48xf32> -> vector<17x48xf32>
    %9 = arith.addf %2, %8 : vector<17x48xf32>
    %c1 = arith.constant 1 : index
    %c0_10 = arith.constant 0 : index
    %c0_11 = arith.constant 0 : index
    %10 = vector.load %arg2[%c1, %c0_10, %c0_11] : memref<3x64x48xf32, #tpu.memory_space<vmem>>, vector<1x64x48xf32>
    %11 = vector.shape_cast %10 : vector<1x64x48xf32> to vector<64x48xf32>
    %cst_12 = arith.constant dense<0.000000e+00> : vector<8x48xf32>
    %12 = tpu.matmul %1, %11, %cst_12 {dimension_numbers = #tpu.dot_dimension_numbers<[1], [0], [0], [1], [0, 0, 1, 1], [], []>} : vector<8x64xf32>, vector<64x48xf32>, vector<8x48xf32> -> vector<8x48xf32>
    %c1_13 = arith.constant 1 : index
    %c0_14 = arith.constant 0 : index
    %c0_15 = arith.constant 0 : index
    %13 = vector.load %arg3[%c1_13, %c0_14, %c0_15] : memref<3x17x8xf32, #tpu.memory_space<vmem>>, vector<1x17x8xf32>
    %14 = vector.shape_cast %13 : vector<1x17x8xf32> to vector<17x8xf32>
    %cst_16 = arith.constant dense<0.000000e+00> : vector<17x48xf32>
    %15 = tpu.matmul %14, %12, %cst_16 {dimension_numbers = #tpu.dot_dimension_numbers<[1], [0], [0], [1], [0, 0, 1, 1], [], []>} : vector<17x8xf32>, vector<8x48xf32>, vector<17x48xf32> -> vector<17x48xf32>
    %16 = arith.addf %9, %15 : vector<17x48xf32>
    %c2 = arith.constant 2 : index
    %c0_17 = arith.constant 0 : index
    %c0_18 = arith.constant 0 : index
    %17 = vector.load %arg2[%c2, %c0_17, %c0_18] : memref<3x64x48xf32, #tpu.memory_space<vmem>>, vector<1x64x48xf32>
    %18 = vector.shape_cast %17 : vector<1x64x48xf32> to vector<64x48xf32>
    %cst_19 = arith.constant dense<0.000000e+00> : vector<8x48xf32>
    %19 = tpu.matmul %1, %18, %cst_19 {dimension_numbers = #tpu.dot_dimension_numbers<[1], [0], [0], [1], [0, 0, 1, 1], [], []>} : vector<8x64xf32>, vector<64x48xf32>, vector<8x48xf32> -> vector<8x48xf32>
    %c2_20 = arith.constant 2 : index
    %c0_21 = arith.constant 0 : index
    %c0_22 = arith.constant 0 : index
    %20 = vector.load %arg3[%c2_20, %c0_21, %c0_22] : memref<3x17x8xf32, #tpu.memory_space<vmem>>, vector<1x17x8xf32>
    %21 = vector.shape_cast %20 : vector<1x17x8xf32> to vector<17x8xf32>
    %cst_23 = arith.constant dense<0.000000e+00> : vector<17x48xf32>
    %22 = tpu.matmul %21, %19, %cst_23 {dimension_numbers = #tpu.dot_dimension_numbers<[1], [0], [0], [1], [0, 0, 1, 1], [], []>} : vector<17x8xf32>, vector<8x48xf32>, vector<17x48xf32> -> vector<17x48xf32>
    %23 = arith.addf %16, %22 : vector<17x48xf32>
    %c0_24 = arith.constant 0 : index
    %c0_25 = arith.constant 0 : index
    %24 = vector.load %arg4[%c0_24, %c0_25] : memref<1x48xf32, #tpu.memory_space<vmem>>, vector<1x48xf32>
    %25 = vector.broadcast %24 : vector<1x48xf32> to vector<17x48xf32>
    %26 = arith.addf %23, %25 : vector<17x48xf32>
    %cst_26 = arith.constant 0.000000e+00 : f32
    %27 = vector.broadcast %cst_26 : f32 to vector<17x48xf32>
    %28 = arith.maximumf %26, %27 : vector<17x48xf32>
    %c0_27 = arith.constant 0 : index
    %c0_28 = arith.constant 0 : index
    %c0_29 = arith.constant 0 : index
    %29 = vector.load %arg5[%c0_27, %c0_28, %c0_29] : memref<1x17x48xf32, #tpu.memory_space<vmem>>, vector<1x17x48xf32>
    %30 = vector.shape_cast %29 : vector<1x17x48xf32> to vector<17x48xf32>
    %31 = vector.shape_cast %28 : vector<17x48xf32> to vector<1x17x48xf32>
    tpu.vector_store %arg5[%c0_27, %c0_28, %c0_29], %31 {strides = array<i32>} : memref<1x17x48xf32, #tpu.memory_space<vmem>>, vector<1x17x48xf32>,
    return
  }
  func.func @transform_0(%arg0: i32) -> (i32, i32, i32) {
    %c0_i32 = arith.constant 0 : i32
    %c0_i32_0 = arith.constant 0 : i32
    %c0_i32_1 = arith.constant 0 : i32
    return %arg0, %c0_i32, %c0_i32_0 : i32, i32, i32
  }
  func.func @transform_1(%arg0: i32) -> (i32, i32, i32) {
    %c0_i32 = arith.constant 0 : i32
    %c0_i32_0 = arith.constant 0 : i32
    %c0_i32_1 = arith.constant 0 : i32
    %c0_i32_2 = arith.constant 0 : i32
    return %c0_i32, %c0_i32_0, %c0_i32_1 : i32, i32, i32
  }
  func.func @transform_2(%arg0: i32) -> (i32, i32, i32) {
    %c0_i32 = arith.constant 0 : i32
    %c0_i32_0 = arith.constant 0 : i32
    %c0_i32_1 = arith.constant 0 : i32
    %c0_i32_2 = arith.constant 0 : i32
    return %c0_i32, %c0_i32_0, %c0_i32_1 : i32, i32, i32
  }
  func.func @transform_3(%arg0: i32) -> (i32, i32) {
    %c0_i32 = arith.constant 0 : i32
    %c0_i32_0 = arith.constant 0 : i32
    %c0_i32_1 = arith.constant 0 : i32
    return %c0_i32, %c0_i32_0 : i32, i32
  }
  func.func @transform_4(%arg0: i32) -> (i32, i32, i32) {
    %c0_i32 = arith.constant 0 : i32
    %c0_i32_0 = arith.constant 0 : i32
    %c0_i32_1 = arith.constant 0 : i32
    return %arg0, %c0_i32, %c0_i32_0 : i32, i32, i32
  }
}

</mosaic_0001>

<bundles_post_ra>
// kernel: tpu_custom_call.1
= control target key start
LH: loop header
LB: loop body
LE: loop exit
PB: predicated region body
PF: predicated region fallthrough
CT: control target
= control target key end

     0   :  { %s1048_s15 = smov 0   ;;  %s1232_s0 = inlined_call_operand.vmem [shape: f32[2,8,64], index: 0, kind: input, shape index: {}]   ;;  %s1233_s1 = inlined_call_operand.vmem [shape: f32[3,64,48], index: 1, kind: input, shape index: {}]   ;;  %s1234_s2 = inlined_call_operand.vmem [shape: f32[3,17,8], index: 2, kind: input, shape index: {}]   ;;  %s1235_s3 = inlined_call_operand.vmem [shape: f32[1,48], index: 3, kind: input, shape index: {}]   ;;  %s1236_s4 = inlined_call_operand.vmem [shape: f32[2,17,48], index: 4, kind: output, shape index: {}]  }
   0x1 LB: > { %s791_s16 = sadd.s32 4294967295, %s1018_s15   ;;  %p795_p0 = scmp.ge.s32.totalorder %s1018_s15, 1  ;;  %s1018_s15 = sphi %s1048_s15, %s14_s15  }
   0x2   : > { %p161_p1 = scmp.lt.s32.totalorder %s1018_s15, 3 }
   0x4   : > { %p162_p2 = pnand %p795_p0, %p161_p1 }
   0x5   : > { %v799_v0 = vld [vmem:[%s1233_s1 + $0x40] sm:$0xff] (!%p162_p2)  ;;  %v800_v1 = vld [vmem:[%s1233_s1 + $0x48] sm:$0xff] (!%p162_p2)  ;;  %v1020_v3 = vmov (!%p162_p2), 0.0|0.0   ;;  %v801_v6 = vld [vmem:[%s1233_s1 + $0x50] sm:$0xff] (!%p162_p2)  ;;  %p1078_p3 = scmp.lt.s32.totalorder (!%p162_p2), %s791_s16, 1  ;;  %vm1021_vm0 = vmmov (!%p162_p2), 0  }
   0x6   : > { %165 = sbr.rel (%p162_p2) target bundleno = 693 (0x2b5), region = 36  ;;  %v196_v2 = vld [vmem:[%s1233_s1] sm:$0xff] (!%p162_p2)  ;;  %976 = vmatprep.subr.bf16.mxu1 (!%p162_p2), %v1020_v3  ;;  %964 = vmatprep.subr.bf16.mxu0 (!%p162_p2), %v1020_v3  ;;  %v977_v4 = vpack.c.bf16 (!%p162_p2), %v800_v1, %v799_v0  ;;  %v197_v5 = vld [vmem:[%s1233_s1 + $0x8] sm:$0xff] (!%p162_p2)  ;;  %v802_v7 = vld [vmem:[%s1233_s1 + $0x58] sm:$0xff] (!%p162_p2)  ;;  %v1022_v11 = vmov (!%p162_p2), 0.0   ;;  %vm204_vm1 = vcmask (!%p162_p2), 523264  }
   0x7   : > { %v965_v8 = vpack.c.bf16 (!%p162_p2), %v197_v5, %v196_v2  ;;  %v198_v9 = vld [vmem:[%s1233_s1 + $0x10] sm:$0xff] (!%p162_p2)  ;;  %v199_v10 = vld [vmem:[%s1233_s1 + $0x18] sm:$0xff] (!%p162_p2)  ;;  %909 = vmatprep.mubr.msk.f32.mxu1 (!%p162_p2), %vm1021_vm0, %v1022_v11  ;;  %890 = vmatprep.mubr.msk.f32.mxu0 (!%p162_p2), %vm1021_vm0, %v1022_v11  ;;  %v980_v12 = vpack.c.bf16 (!%p162_p2), %v802_v7, %v801_v6  ;;  %v803_v14 = vld [vmem:[%s1233_s1 + $0x60] sm:$0xff] (!%p162_p2)  ;;  %vm364_vm2 = vcmask (!%p162_p2), 64512   ;;  %vm731_vm3 = vcmask (!%p162_p2), 392192  }
   0x8   : > { %978 = vmatpush3.bf16.msra.mxu1 (!%p162_p2), %v977_v4  ;;  %v968_v13 = vpack.c.bf16 (!%p162_p2), %v199_v10, %v198_v9  ;;  %v804_v15 = vld [vmem:[%s1233_s1 + $0x68] sm:$0xff] (!%p162_p2)  ;;  %v200_v16 = vld [vmem:[%s1233_s1 + $0x20] sm:$0xff] (!%p162_p2)  ;;  %v805_v20 = vld [vmem:[%s1233_s1 + $0x70] sm:$0xff] (!%p162_p2)  ;;  %vm734_vm4 = vcmask (!%p162_p2), 385024  }
   0x9   : > { %966 = vmatpush3.bf16.msra.mxu0 (!%p162_p2), %v965_v8  ;;  %979 = vmatprep.subr.bf16.mxu1 (!%p162_p2), %v1020_v3  ;;  %v201_v17 = vld [vmem:[%s1233_s1 + $0x28] sm:$0xff] (!%p162_p2)  ;;  %v983_v18 = vpack.c.bf16 (!%p162_p2), %v804_v15, %v803_v14  ;;  %v806_v21 = vld [vmem:[%s1233_s1 + $0x78] sm:$0xff] (!%p162_p2)  ;;  %v202_v22 = vld [vmem:[%s1233_s1 + $0x30] sm:$0xff] (!%p162_p2) }
   0xa   : > { %967 = vmatprep.subr.bf16.mxu0 (!%p162_p2), %v1020_v3  ;;  %v971_v19 = vpack.c.bf16 (!%p162_p2), %v201_v17, %v200_v16  ;;  %v203_v23 = vld [vmem:[%s1233_s1 + $0x38] sm:$0xff] (!%p162_p2)  ;;  %v986_v24 = vpack.c.bf16 (!%p162_p2), %v806_v21, %v805_v20  ;;  %v817_v27 = vld [vmem:[%s1233_s1 + $0x80] sm:$0xff] (!%p162_p2)  ;;  %v818_v28 = vld [vmem:[%s1233_s1 + $0x88] sm:$0xff] (!%p162_p2) }
   0xb   : > { %v974_v25 = vpack.c.bf16 (!%p162_p2), %v203_v23, %v202_v22  ;;  %v808_v29 = vld [vmem:[%s1234_s2 + $0x18] sm:$0xff] (!%p162_p2)  ;;  %v278_v31 = vld [vmem:[%s1234_s2] sm:$0xff] (!%p162_p2)  ;;  %v989_v32 = vpack.c.bf16 (!%p162_p2), %v818_v28, %v817_v27  ;;  %v819_v35 = vld [vmem:[%s1233_s1 + $0x90] sm:$0xff] (!%p162_p2) }
   0xc   : > { %981 = vmatpush3.bf16.msra.mxu1 (!%p162_p2), %v980_v12  ;;  %v820_v36 = vld [vmem:[%s1233_s1 + $0x98] sm:$0xff] (!%p162_p2)  ;;  %v809_v38 = vld [vmem:[%s1234_s2 + $0x20] sm:$0xff] (!%p162_p2)  ;;  %v279_v40 = vld [vmem:[%s1234_s2 + $0x8] sm:$0xff] (!%p162_p2) }
   0xd   : > { %s1239_s16 = smov (!%p1078_p3, %s791_s16), 1  ;;  %969 = vmatpush3.bf16.msra.mxu0 %v968_v13  ;;  %982 = vmatprep.subr.bf16.mxu1 %v1020_v3  ;;  %v992_v39 = vpack.c.bf16 %v820_v36, %v819_v35  ;;  %v821_v41 = vld [vmem:[%s1233_s1 + $0xa0] sm:$0xff]  ;;  %v822_v42 = vld [vmem:[%s1233_s1 + $0xa8] sm:$0xff]  ;;  %v280_v45 = vld [vmem:[%s1234_s2 + $0x10] sm:$0x1] }
   0xe   : > { %970 = vmatprep.subr.bf16.mxu0 %v1020_v3  ;;  %s796_s26 = sshll.u32 %s1239_s16, 3  ;;  %v810_v43 = vld [vmem:[%s1234_s2 + $0x28] sm:$0x1]  ;;  %v995_v44 = vpack.c.bf16 %v822_v42, %v821_v41  ;;  %v823_v46 = vld [vmem:[%s1233_s1 + $0xb0] sm:$0xff]  ;;  %v824_v47 = vld [vmem:[%s1233_s1 + $0xb8] sm:$0xff]  ;;  %s1000_s14 = smul.u32 24, %s1239_s16 }
   0xf   : > { %s189_s29 = scalar_lea.vmem %s1232_s0, %s796_s26  ;;  %v998_v48 = vpack.c.bf16 %v824_v47, %v823_v46  ;;  %v826_v0 = vld [vmem:[%s1234_s2 + $0x30] sm:$0xff]  ;;  %v828_v4 = vld [vmem:[%s1234_s2 + $0x40] sm:$0x1] }
  0x10   : > { %984 = vmatpush3.bf16.msra.mxu1 %v983_v18  ;;  %v195_v26 = vld [vmem:[%s189_s29] sm:$0xff]  ;;  %s194_s21 = scalar_lea.vmem %s1236_s4, %s1000_s14 }
  0x11   : > { %972 = vmatpush3.bf16.msra.mxu0 %v971_v19  ;;  %985 = vmatprep.subr.bf16.mxu1 %v1020_v3  ;;  %v832_v6 = vld [vmem:[%s1235_s3] ss:$0 sm:$0xff] }
  0x12   : > { %973 = vmatprep.subr.bf16.mxu0 %v1020_v3 }
  0x14   : > { %987 = vmatpush3.bf16.msra.mxu1 %v986_v24 }
  0x15   : > { %975 = vmatpush3.bf16.msra.mxu0 %v974_v25  ;;  %923 = vmatprep.subr.mxu1 %v1022_v11 }
  0x16   : > { %912 = vmatprep.subr.mxu0 %v1022_v11 }
  0x17   : > { %910 = vmatmul.mubr.msk.f32.vlgmr.msra.gmra.mrb[0].mxu1 %vm204_vm1, %v195_v26 }
  0x18   : > { %891 = vmatmul.mubr.msk.f32.vlgmr.msra.gmra.mrb[0].mxu0 %vm204_vm1, %v195_v26  ;;  %925 = vmatprep.mubr.msk.f32.mxu1 %vm1021_vm0, %v1022_v11 }
  0x19   : > { %914 = vmatprep.mubr.msk.f32.mxu0 %vm1021_vm0, %v1022_v11 }
  0xea   : > { %v356_v30 = vpop.f32.mrb[0].mxu1 }
  0xeb   : > { %v274_v33 = vpop.f32.mrb[0].mxu0  ;;  %v911_v34 = vpop.f32.mrb[1].mxu1  ;;  %913 = vmatpush3.msra.mxu0 %v356_v30 }
  0xec   : > { %915 = vmatmul.mubr.msk.f32.vlgmr.msra.gmra.mrb[2].mxu0 %vm364_vm2, %v808_v29  ;;  %924 = vmatpush3.msra.mxu1 %v274_v33  ;;  %v892_v37 = vpop.f32.mrb[1].mxu0 }
  0xed   : > { %988 = vmatprep.subr.bf16.mxu0 %v1020_v3  ;;  %926 = vmatmul.mubr.msk.f32.vlgmr.msra.gmra.mrb[2].mxu1 %vm364_vm2, %v278_v31 }
  0xee   : > { %990 = vmatpush3.bf16.msra.mxu0 %v989_v32  ;;  %917 = vmatprep.mubr.msk.f32.mxu0 %vm1021_vm0, %v1022_v11 }
  0xef   : > { %991 = vmatprep.subr.bf16.mxu0 %v1020_v3  ;;  %928 = vmatprep.mubr.msk.f32.mxu1 %vm1021_vm0, %v1022_v11 }
  0xf0   : > { %918 = vmatmul.mubr.msk.f32.gmra.mrb[4].mxu0 %vm364_vm2, %v809_v38  ;;  %953 = vmatprep.subr.mxu1 %v1022_v11 }
  0xf1   : > { %929 = vmatmul.mubr.msk.f32.gmra.mrb[4].mxu1 %vm364_vm2, %v279_v40  ;;  %920 = vmatprep.mubr.msk.f32.mxu0 %vm1021_vm0, %v1022_v11 }
  0xf2   : > { %993 = vmatpush3.bf16.msra.mxu0 %v992_v39  ;;  %931 = vmatprep.mubr.msk.f32.mxu1 %vm1021_vm0, %v1022_v11 }
  0xf3   : > { %994 = vmatprep.subr.bf16.mxu0 %v1020_v3 }
  0xf4   : > { %921 = vmatmul.mubr.msk.f32.gmra.mrb[6].mxu0 %vm364_vm2, %v810_v43 }
  0xf5   : > { %932 = vmatmul.mubr.msk.f32.gmra.mrb[6].mxu1 %vm364_vm2, %v280_v45  ;;  %950 = vmatprep.mubr.msk.f32.mxu0 %vm1021_vm0, %v1022_v11 }
  0xf6   : > { %996 = vmatpush3.bf16.msra.mxu0 %v995_v44  ;;  %955 = vmatprep.mubr.msk.f32.mxu1 %vm1021_vm0, %v1022_v11 }
  0xf7   : > { %997 = vmatprep.subr.bf16.mxu0 %v1020_v3  ;;  %v827_v3 = vld [vmem:[%s1234_s2 + $0x38] sm:$0xff] }
  0xfa   : > { %999 = vmatpush3.bf16.msra.mxu0 %v998_v48 }
  0xfd   : > { %951 = vmatmul.mubr.msk.f32.vlgmr.msra.gmra.mrb[8].mxu0 %vm204_vm1, %v195_v26 }
 0x1bf   : > { %v440_v49 = vpop.f32.mrb[2].mxu0 }
 0x1c0   : > { %v916_v50 = vpop.f32.mrb[3].mxu0  ;;  %v529_v51 = vpop.f32.mrb[2].mxu1 }
 0x1c1   : > { %v530_v52 = vadd.f32 %v529_v51, %v440_v49  ;;  %v927_v53 = vpop.f32.mrb[3].mxu1 }
 0x1c3   : > { %v445_v54 = vpop.f32.mrb[4].mxu0 }
 0x1c4   : > { %v919_v55 = vpop.f32.mrb[5].mxu0  ;;  %v534_v56 = vpop.f32.mrb[4].mxu1 }
 0x1c5   : > { %v535_v57 = vadd.f32 %v534_v56, %v445_v54  ;;  %v930_v58 = vpop.f32.mrb[5].mxu1 }
 0x1c7   : > { %v450_v59 = vpop.f32.mrb[6].mxu0 }
 0x1c8   : > { %v922_v60 = vpop.f32.mrb[7].mxu0  ;;  %v539_v61 = vpop.f32.mrb[6].mxu1 }
 0x1c9   : > { %v540_v62 = vadd.f32 %v539_v61, %v450_v59  ;;  %v933_v63 = vpop.f32.mrb[7].mxu1 }
 0x1d0   : > { %v618_v1 = vpop.f32.mrb[8].mxu0 }
 0x1d1   : > { %v952_v2 = vpop.f32.mrb[9].mxu0  ;;  %954 = vmatpush3.msra.mxu1 %v618_v1 }
 0x1d2   : > { %956 = vmatmul.mubr.msk.f32.vlgmr.msra.gmra.mrb[8].mxu1 %vm364_vm2, %v826_v0 }
 0x1d3   : > { %958 = vmatprep.mubr.msk.f32.mxu1 %vm1021_vm0, %v1022_v11 }
 0x1d6   : > { %959 = vmatmul.mubr.msk.f32.gmra.mrb[10].mxu1 %vm364_vm2, %v827_v3 }
 0x1d7   : > { %961 = vmatprep.mubr.msk.f32.mxu1 %vm1021_vm0, %v1022_v11 }
 0x1da   : > { %962 = vmatmul.mubr.msk.f32.gmra.mrb[12].mxu1 %vm364_vm2, %v828_v4 }
 0x2a5   : > { %v701_v5 = vpop.f32.mrb[8].mxu1 }
 0x2a6   : > { %v715_v7 = vadd.f32 %v701_v5, %v530_v52  ;;  %v957_v8 = vpop.f32.mrb[9].mxu1 }
 0x2a8   : > { %v725_v9 = vadd.f32 %v832_v6, %v715_v7 }
 0x2a9   : > { %v706_v10 = vpop.f32.mrb[10].mxu1 }
 0x2aa   : > { %v728_v11 = vmax.f32 %v725_v9, 0.0  ;;  %v716_v12 = vadd.f32 %v706_v10, %v535_v57  ;;  %v960_v13 = vpop.f32.mrb[11].mxu1 }
 0x2ac   : > { %732 = vst.msk [vmem:[%s194_s21] sm:$0xff] %vm731_vm3, %v728_v11  ;;  %v726_v14 = vadd.f32 %v832_v6, %v716_v12 }
 0x2ad   : > { %v711_v15 = vpop.f32.mrb[12].mxu1 }
 0x2ae   : > { %v729_v16 = vmax.f32 %v726_v14, 0.0  ;;  %v717_v17 = vadd.f32 %v711_v15, %v540_v62  ;;  %v963_v18 = vpop.f32.mrb[13].mxu1 }
 0x2b0   : > { %733 = vst.msk [vmem:[%s194_s21 + $0x8] sm:$0xff] %vm731_vm3, %v729_v16  ;;  %v727_v19 = vadd.f32 %v832_v6, %v717_v17 }
 0x2b2   : > { %v730_v20 = vmax.f32 %v727_v19, 0.0 }
 0x2b4   : > { %735 = vst.msk [vmem:[%s194_s21 + $0x10] sm:$0x1] %vm734_vm4, %v730_v20 }
 0x2b5 PF: > { %s14_s15 = sadd.s32 1, %s1018_s15  }
 0x2b6   : > { %p11_p4 = scmp.ge.s32.totalorder %s14_s15, 4  }
 0x2b8   :  { %13 = sbr.rel (!%p11_p4) target bundleno = 1 (0x1), region = 70 }

</bundles_post_ra>
